<compile_context>
chip_gen: v7x
topology: tpu7x:2x2x1
jax: 0.10.0
libtpu: 0.0.40
codegen_flags: <defaults>
</compile_context>

<pallas_src>
import functools

import jax
import jax.numpy as jnp
from jax.experimental import pallas as pl
from jax.experimental.pallas import tpu as pltpu


# ----------------------------------------------------------------------------
# Kernel
# ----------------------------------------------------------------------------
def _conv_taps(a, masks, w_ref, b_ref):
    """'Same' conv (H direction) as K lane-dense MXU matmuls on register data.

    a:      (M, WC) f32   activations, M = tn*H rows (batch elements stacked)
    masks:  list of K (M, WC) bool (None at the centre tap); zero rows whose
            kh-shifted source falls outside its own batch element
    w_ref:  (K, WC, WC) bf16  banded weights (kw taps + W padding folded in)
    b_ref:  (1, WC) f32       bias tiled over W
    """
    M, WC = a.shape
    K = w_ref.shape[0]
    p = K // 2
    acc = jnp.zeros((M, WC), jnp.float32)
    for kh in range(K):                      # static unroll, K = 3
        dh = kh - p
        if dh == 0:
            tap = a
        else:
            tap = pltpu.roll(a, (-dh) % M, axis=0)   # tap[j] = a[j + dh]
            tap = jnp.where(masks[kh], tap, 0.0)
        acc = acc + jnp.dot(tap.astype(jnp.bfloat16), w_ref[kh],
                            preferred_element_type=jnp.float32)
    return acc + b_ref[...]                  # (1, WC) broadcasts over rows


def resblock_kernel(x_ref, w1_ref, b1_ref, w2_ref, b2_ref, out_ref, *, H):
    # Per grid step (tn stacked batch elements):
    #   x_ref / out_ref: (tn*H, W*C) f32
    #   w*_ref:          (K, W*C, W*C) bf16
    #   b*_ref:          (1, W*C) f32
    M, WC = x_ref.shape
    K = w1_ref.shape[0]
    p = K // 2

    x = x_ref[...]  # read once: conv input + residual

    # Boundary masks, computed once and reused by both convs: row index within
    # its batch element; the kh-shifted tap is valid iff row+dh stays in [0,H).
    row = jax.lax.broadcasted_iota(jnp.int32, (M, WC), 0) % H
    masks = [None if kh == p
             else ((row + (kh - p) >= 0) & (row + (kh - p) < H))
             for kh in range(K)]

    y = _conv_taps(x, masks, w1_ref, b1_ref)      # conv #1 + bias
    y = jnp.maximum(y, 0.0)                       # ReLU
    z = _conv_taps(y, masks, w2_ref, b2_ref)      # conv #2 + bias
    out_ref[...] = (z + x).astype(out_ref.dtype)  # residual add


# ----------------------------------------------------------------------------
# Wrapper
# ----------------------------------------------------------------------------
def _banded_weight(w, W):
    """(K, K, C, Cout) HWIO -> (K, W*C, W*Cout).

    Folds the kw taps and the W-direction 'same' zero padding into a banded
    block matrix: block (wi, wo) = w[kh, wi - wo + p] when in range, else 0.
    """
    K, _, C, Cout = w.shape
    p = K // 2
    wi = jnp.arange(W)[:, None]
    wo = jnp.arange(W)[None, :]
    kw = wi - wo + p                                   # (W, W)
    valid = (kw >= 0) & (kw < K)
    B = w[:, jnp.clip(kw, 0, K - 1)]                   # (K, W, W, C, Cout)
    B = B * valid[None, :, :, None, None].astype(w.dtype)
    B = jnp.transpose(B, (0, 1, 3, 2, 4))              # (K, W, C, W, Cout)
    return B.reshape(K, W * C, W * Cout)


def resblock_forward_nhwc(x, w1, b1, w2, b2, *, tn=None):
    """x: (N,H,W,C) f32; w: (K,K,C,C) HWIO; b: (C,). Returns (N,H,W,C)."""
    N, H, W, C = x.shape
    K = w1.shape[0]
    WC = W * C
    if tn is None:
        tn = N          # stack the whole batch into one grid step (toy sizes)
    assert N % tn == 0, "batch must be divisible by the batch tile"
    M = tn * H

    # Lane-dense 2-D activation slab (free reshape: contiguous trailing dims).
    x_f = x.reshape(N * H, WC)

    # Weight / bias prep (tiny, outside the kernel): banded fold + bf16 cast.
    B1 = _banded_weight(w1, W).astype(jnp.bfloat16)
    B2 = _banded_weight(w2, W).astype(jnp.bfloat16)
    b1r = jnp.tile(b1, W).reshape(1, WC).astype(jnp.float32)
    b2r = jnp.tile(b2, W).reshape(1, WC).astype(jnp.float32)

    flops = 2 * (2 * K * N * H * WC * WC)        # two convs, K MXU taps each
    bytes_accessed = (2 * N * H * WC * 4         # x in + out (f32)
                      + 2 * K * WC * WC * 2      # banded bf16 weights
                      + 2 * WC * 4)              # biases

    grid_spec = pltpu.PrefetchScalarGridSpec(
        num_scalar_prefetch=0,
        grid=(N // tn,),
        in_specs=[
            pl.BlockSpec((M, WC), lambda n: (n, 0)),         # x rows
            pl.BlockSpec((K, WC, WC), lambda n: (0, 0, 0)),  # banded w1
            pl.BlockSpec((1, WC), lambda n: (0, 0)),         # b1
            pl.BlockSpec((K, WC, WC), lambda n: (0, 0, 0)),  # banded w2
            pl.BlockSpec((1, WC), lambda n: (0, 0)),         # b2
        ],
        out_specs=pl.BlockSpec((M, WC), lambda n: (n, 0)),
    )
    y = pl.pallas_call(
        functools.partial(resblock_kernel, H=H),
        out_shape=jax.ShapeDtypeStruct((N * H, WC), x.dtype),
        grid_spec=grid_spec,
        compiler_params=pltpu.CompilerParams(
            dimension_semantics=("parallel",)),
        cost_estimate=pl.CostEstimate(
            flops=flops, transcendentals=0, bytes_accessed=bytes_accessed),
    )(x_f, B1, b1r, B2, b2r)
    return y.reshape(N, H, W, C)


def resblock_forward_nchw(x_nchw, w1, b1, w2, b2):
    """Matches PyTorch ResBlock.forward: input/output NCHW."""
    x = jnp.transpose(x_nchw, (0, 2, 3, 1))   # NCHW -> NHWC
    y = resblock_forward_nhwc(x, w1, b1, w2, b2)
    return jnp.transpose(y, (0, 3, 1, 2))     # NHWC -> NCHW


# ----------------------------------------------------------------------------
# Pure-JAX reference
# ----------------------------------------------------------------------------
def _ref_forward_nhwc(x, w1, b1, w2, b2):
    dn = jax.lax.conv_dimension_numbers(x.shape, w1.shape,
                                        ("NHWC", "HWIO", "NHWC"))
    y = jax.lax.conv_general_dilated(x, w1, (1, 1), "SAME",
                                     dimension_numbers=dn) + b1
    y = jnp.maximum(y, 0.0)
    y = jax.lax.conv_general_dilated(y, w2, (1, 1), "SAME",
                                     dimension_numbers=dn) + b2
    return y + x


if __name__ == "__main__":
    # Small shapes consistent with the module: batch=2, n_feats=8, 16x16, k=3.
    # (W*C = 16*8 = 128 -> exactly one lane-dense vreg width.)
    N, C, H, W, K = 2, 8, 16, 16, 3

    key = jax.random.PRNGKey(0)
    kx, k1, kb1, k2, kb2 = jax.random.split(key, 5)
    x_nchw = jax.random.normal(kx, (N, C, H, W), dtype=jnp.float32)
    w1 = jax.random.normal(k1, (K, K, C, C), dtype=jnp.float32) * 0.1
    b1 = jax.random.normal(kb1, (C,), dtype=jnp.float32) * 0.1
    w2 = jax.random.normal(k2, (K, K, C, C), dtype=jnp.float32) * 0.1
    b2 = jax.random.normal(kb2, (C,), dtype=jnp.float32) * 0.1

    out = resblock_forward_nchw(x_nchw, w1, b1, w2, b2)
    out = jax.block_until_ready(out)

    # Correctness check against a full-f32 pure-JAX reference.  The kernel
    # runs the MXU in bf16 (f32 accumulate), so use a bf16-appropriate
    # tolerance.
    x_nhwc = jnp.transpose(x_nchw, (0, 2, 3, 1))
    ref = _ref_forward_nhwc(x_nhwc, w1, b1, w2, b2)
    ref = jnp.transpose(ref, (0, 3, 1, 2))
    assert out.shape == (N, C, H, W)
    assert jnp.allclose(out, ref, atol=5e-2, rtol=5e-2), (
        float(jnp.max(jnp.abs(out - ref))))

    print("KERNEL_OK")
</pallas_src>

<mosaic_0001>
module attributes {stable_mosaic.version = 11 : i64} {
  func.func @resblock_kernel(%arg0: i32, %arg1: memref<32x128xf32, #tpu.memory_space<vmem>>, %arg2: memref<3x128x128xbf16, #tpu.memory_space<vmem>>, %arg3: memref<1x128xf32, #tpu.memory_space<vmem>>, %arg4: memref<3x128x128xbf16, #tpu.memory_space<vmem>>, %arg5: memref<1x128xf32, #tpu.memory_space<vmem>>, %arg6: memref<32x128xf32, #tpu.memory_space<vmem>>) attributes {dimension_semantics = [#tpu.dimension_semantics<parallel>], iteration_bounds = array<i64: 1>, scalar_prefetch = 0 : i64, scratch_operands = 0 : i64, tpu.core_type = #tpu.core_type<tc>, window_params = [{transform_indices = @transform_0, window_bounds = array<i64: 32, 128>}, {pipeline_mode = #tpu.pipeline_mode<synchronous>, transform_indices = @transform_1, window_bounds = array<i64: 3, 128, 128>}, {pipeline_mode = #tpu.pipeline_mode<synchronous>, transform_indices = @transform_2, window_bounds = array<i64: 1, 128>}, {pipeline_mode = #tpu.pipeline_mode<synchronous>, transform_indices = @transform_3, window_bounds = array<i64: 3, 128, 128>}, {pipeline_mode = #tpu.pipeline_mode<synchronous>, transform_indices = @transform_4, window_bounds = array<i64: 1, 128>}, {transform_indices = @transform_5, window_bounds = array<i64: 32, 128>}]} {
    %c0 = arith.constant 0 : index
    %c0_0 = arith.constant 0 : index
    %0 = vector.load %arg1[%c0, %c0_0] : memref<32x128xf32, #tpu.memory_space<vmem>>, vector<32x128xf32>
    %1 = tpu.iota {dimensions = array<i32: 0>} : vector<32x128xi32>
    %c16_i32 = arith.constant 16 : i32
    %c0_i32 = arith.constant 0 : i32
    %2 = arith.cmpi eq, %c16_i32, %c0_i32 : i32
    %c1_i32 = arith.constant 1 : i32
    %3 = arith.select %2, %c1_i32, %c16_i32 : i32
    %4 = vector.broadcast %3 : i32 to vector<32x128xi32>
    %5 = arith.remsi %1, %4 : vector<32x128xi32>
    %c0_i32_1 = arith.constant 0 : i32
    %6 = vector.broadcast %c0_i32_1 : i32 to vector<32x128xi32>
    %7 = arith.cmpi ne, %5, %6 : vector<32x128xi32>
    %c0_i32_2 = arith.constant 0 : i32
    %8 = vector.broadcast %c0_i32_2 : i32 to vector<32x128xi32>
    %9 = arith.cmpi slt, %5, %8 : vector<32x128xi32>
    %c0_i32_3 = arith.constant 0 : i32
    %10 = arith.cmpi slt, %3, %c0_i32_3 : i32
    %11 = vector.broadcast %10 : i1 to vector<32x128xi1>
    %12 = vector.broadcast %11 : vector<32x128xi1> to vector<32x128xi1>
    %13 = arith.xori %9, %12 : vector<32x128xi1>
    %14 = arith.andi %13, %7 : vector<32x128xi1>
    %15 = vector.broadcast %3 : i32 to vector<32x128xi32>
    %16 = arith.addi %5, %15 : vector<32x128xi32>
    %17 = arith.select %14, %16, %5 : vector<32x128xi1>, vector<32x128xi32>
    %c-1_i32 = arith.constant -1 : i32
    %18 = vector.broadcast %c-1_i32 : i32 to vector<32x128xi32>
    %19 = arith.addi %17, %18 : vector<32x128xi32>
    %c0_i32_4 = arith.constant 0 : i32
    %20 = vector.broadcast %c0_i32_4 : i32 to vector<32x128xi32>
    %21 = arith.cmpi sge, %19, %20 : vector<32x128xi32>
    %c-1_i32_5 = arith.constant -1 : i32
    %22 = vector.broadcast %c-1_i32_5 : i32 to vector<32x128xi32>
    %23 = arith.addi %17, %22 : vector<32x128xi32>
    %c16_i32_6 = arith.constant 16 : i32
    %24 = vector.broadcast %c16_i32_6 : i32 to vector<32x128xi32>
    %25 = arith.cmpi slt, %23, %24 : vector<32x128xi32>
    %26 = arith.andi %21, %25 : vector<32x128xi1>
    %c1_i32_7 = arith.constant 1 : i32
    %27 = vector.broadcast %c1_i32_7 : i32 to vector<32x128xi32>
    %28 = arith.addi %17, %27 : vector<32x128xi32>
    %c0_i32_8 = arith.constant 0 : i32
    %29 = vector.broadcast %c0_i32_8 : i32 to vector<32x128xi32>
    %30 = arith.cmpi sge, %28, %29 : vector<32x128xi32>
    %c1_i32_9 = arith.constant 1 : i32
    %31 = vector.broadcast %c1_i32_9 : i32 to vector<32x128xi32>
    %32 = arith.addi %17, %31 : vector<32x128xi32>
    %c16_i32_10 = arith.constant 16 : i32
    %33 = vector.broadcast %c16_i32_10 : i32 to vector<32x128xi32>
    %34 = arith.cmpi slt, %32, %33 : vector<32x128xi32>
    %35 = arith.andi %30, %34 : vector<32x128xi1>
    %cst = arith.constant 0.000000e+00 : f32
    %36 = vector.broadcast %cst : f32 to vector<32x128xf32>
    %c1_i32_11 = arith.constant 1 : i32
    %37 = tpu.dynamic_rotate %0 by %c1_i32_11 dim 0 : vector<32x128xf32>, i32 -> vector<32x128xf32>
    %cst_12 = arith.constant 0.000000e+00 : f32
    %38 = vector.broadcast %cst_12 : f32 to vector<32x128xf32>
    %39 = arith.select %26, %37, %38 : vector<32x128xi1>, vector<32x128xf32>
    %40 = arith.truncf %39 : vector<32x128xf32> to vector<32x128xbf16>
    %c0_13 = arith.constant 0 : index
    %c0_14 = arith.constant 0 : index
    %c0_15 = arith.constant 0 : index
    %41 = vector.load %arg2[%c0_13, %c0_14, %c0_15] : memref<3x128x128xbf16, #tpu.memory_space<vmem>>, vector<1x128x128xbf16>
    %42 = vector.shape_cast %41 : vector<1x128x128xbf16> to vector<128x128xbf16>
    %cst_16 = arith.constant dense<0.000000e+00> : vector<32x128xf32>
    %43 = tpu.matmul %40, %42, %cst_16 {dimension_numbers = #tpu.dot_dimension_numbers<[1], [0], [0], [1], [0, 0, 1, 1], [], []>} : vector<32x128xbf16>, vector<128x128xbf16>, vector<32x128xf32> -> vector<32x128xf32>
    %44 = arith.addf %36, %43 : vector<32x128xf32>
    %45 = arith.truncf %0 : vector<32x128xf32> to vector<32x128xbf16>
    %c1 = arith.constant 1 : index
    %c0_17 = arith.constant 0 : index
    %c0_18 = arith.constant 0 : index
    %46 = vector.load %arg2[%c1, %c0_17, %c0_18] : memref<3x128x128xbf16, #tpu.memory_space<vmem>>, vector<1x128x128xbf16>
    %47 = vector.shape_cast %46 : vector<1x128x128xbf16> to vector<128x128xbf16>
    %cst_19 = arith.constant dense<0.000000e+00> : vector<32x128xf32>
    %48 = tpu.matmul %45, %47, %cst_19 {dimension_numbers = #tpu.dot_dimension_numbers<[1], [0], [0], [1], [0, 0, 1, 1], [], []>} : vector<32x128xbf16>, vector<128x128xbf16>, vector<32x128xf32> -> vector<32x128xf32>
    %49 = arith.addf %44, %48 : vector<32x128xf32>
    %c31_i32 = arith.constant 31 : i32
    %50 = tpu.dynamic_rotate %0 by %c31_i32 dim 0 : vector<32x128xf32>, i32 -> vector<32x128xf32>
    %cst_20 = arith.constant 0.000000e+00 : f32
    %51 = vector.broadcast %cst_20 : f32 to vector<32x128xf32>
    %52 = arith.select %35, %50, %51 : vector<32x128xi1>, vector<32x128xf32>
    %53 = arith.truncf %52 : vector<32x128xf32> to vector<32x128xbf16>
    %c2 = arith.constant 2 : index
    %c0_21 = arith.constant 0 : index
    %c0_22 = arith.constant 0 : index
    %54 = vector.load %arg2[%c2, %c0_21, %c0_22] : memref<3x128x128xbf16, #tpu.memory_space<vmem>>, vector<1x128x128xbf16>
    %55 = vector.shape_cast %54 : vector<1x128x128xbf16> to vector<128x128xbf16>
    %cst_23 = arith.constant dense<0.000000e+00> : vector<32x128xf32>
    %56 = tpu.matmul %53, %55, %cst_23 {dimension_numbers = #tpu.dot_dimension_numbers<[1], [0], [0], [1], [0, 0, 1, 1], [], []>} : vector<32x128xbf16>, vector<128x128xbf16>, vector<32x128xf32> -> vector<32x128xf32>
    %57 = arith.addf %49, %56 : vector<32x128xf32>
    %c0_24 = arith.constant 0 : index
    %c0_25 = arith.constant 0 : index
    %58 = vector.load %arg3[%c0_24, %c0_25] : memref<1x128xf32, #tpu.memory_space<vmem>>, vector<1x128xf32>
    %59 = vector.broadcast %58 : vector<1x128xf32> to vector<32x128xf32>
    %60 = arith.addf %57, %59 : vector<32x128xf32>
    %cst_26 = arith.constant 0.000000e+00 : f32
    %61 = vector.broadcast %cst_26 : f32 to vector<32x128xf32>
    %62 = arith.maximumf %60, %61 : vector<32x128xf32>
    %cst_27 = arith.constant 0.000000e+00 : f32
    %63 = vector.broadcast %cst_27 : f32 to vector<32x128xf32>
    %c1_i32_28 = arith.constant 1 : i32
    %64 = tpu.dynamic_rotate %62 by %c1_i32_28 dim 0 : vector<32x128xf32>, i32 -> vector<32x128xf32>
    %cst_29 = arith.constant 0.000000e+00 : f32
    %65 = vector.broadcast %cst_29 : f32 to vector<32x128xf32>
    %66 = arith.select %26, %64, %65 : vector<32x128xi1>, vector<32x128xf32>
    %67 = arith.truncf %66 : vector<32x128xf32> to vector<32x128xbf16>
    %c0_30 = arith.constant 0 : index
    %c0_31 = arith.constant 0 : index
    %c0_32 = arith.constant 0 : index
    %68 = vector.load %arg4[%c0_30, %c0_31, %c0_32] : memref<3x128x128xbf16, #tpu.memory_space<vmem>>, vector<1x128x128xbf16>
    %69 = vector.shape_cast %68 : vector<1x128x128xbf16> to vector<128x128xbf16>
    %cst_33 = arith.constant dense<0.000000e+00> : vector<32x128xf32>
    %70 = tpu.matmul %67, %69, %cst_33 {dimension_numbers = #tpu.dot_dimension_numbers<[1], [0], [0], [1], [0, 0, 1, 1], [], []>} : vector<32x128xbf16>, vector<128x128xbf16>, vector<32x128xf32> -> vector<32x128xf32>
    %71 = arith.addf %63, %70 : vector<32x128xf32>
    %72 = arith.truncf %62 : vector<32x128xf32> to vector<32x128xbf16>
    %c1_34 = arith.constant 1 : index
    %c0_35 = arith.constant 0 : index
    %c0_36 = arith.constant 0 : index
    %73 = vector.load %arg4[%c1_34, %c0_35, %c0_36] : memref<3x128x128xbf16, #tpu.memory_space<vmem>>, vector<1x128x128xbf16>
    %74 = vector.shape_cast %73 : vector<1x128x128xbf16> to vector<128x128xbf16>
    %cst_37 = arith.constant dense<0.000000e+00> : vector<32x128xf32>
    %75 = tpu.matmul %72, %74, %cst_37 {dimension_numbers = #tpu.dot_dimension_numbers<[1], [0], [0], [1], [0, 0, 1, 1], [], []>} : vector<32x128xbf16>, vector<128x128xbf16>, vector<32x128xf32> -> vector<32x128xf32>
    %76 = arith.addf %71, %75 : vector<32x128xf32>
    %c31_i32_38 = arith.constant 31 : i32
    %77 = tpu.dynamic_rotate %62 by %c31_i32_38 dim 0 : vector<32x128xf32>, i32 -> vector<32x128xf32>
    %cst_39 = arith.constant 0.000000e+00 : f32
    %78 = vector.broadcast %cst_39 : f32 to vector<32x128xf32>
    %79 = arith.select %35, %77, %78 : vector<32x128xi1>, vector<32x128xf32>
    %80 = arith.truncf %79 : vector<32x128xf32> to vector<32x128xbf16>
    %c2_40 = arith.constant 2 : index
    %c0_41 = arith.constant 0 : index
    %c0_42 = arith.constant 0 : index
    %81 = vector.load %arg4[%c2_40, %c0_41, %c0_42] : memref<3x128x128xbf16, #tpu.memory_space<vmem>>, vector<1x128x128xbf16>
    %82 = vector.shape_cast %81 : vector<1x128x128xbf16> to vector<128x128xbf16>
    %cst_43 = arith.constant dense<0.000000e+00> : vector<32x128xf32>
    %83 = tpu.matmul %80, %82, %cst_43 {dimension_numbers = #tpu.dot_dimension_numbers<[1], [0], [0], [1], [0, 0, 1, 1], [], []>} : vector<32x128xbf16>, vector<128x128xbf16>, vector<32x128xf32> -> vector<32x128xf32>
    %84 = arith.addf %76, %83 : vector<32x128xf32>
    %c0_44 = arith.constant 0 : index
    %c0_45 = arith.constant 0 : index
    %85 = vector.load %arg5[%c0_44, %c0_45] : memref<1x128xf32, #tpu.memory_space<vmem>>, vector<1x128xf32>
    %86 = vector.broadcast %85 : vector<1x128xf32> to vector<32x128xf32>
    %87 = arith.addf %84, %86 : vector<32x128xf32>
    %88 = arith.addf %87, %0 : vector<32x128xf32>
    %c0_46 = arith.constant 0 : index
    %c0_47 = arith.constant 0 : index
    %89 = vector.load %arg6[%c0_46, %c0_47] : memref<32x128xf32, #tpu.memory_space<vmem>>, vector<32x128xf32>
    tpu.vector_store %arg6[%c0_46, %c0_47], %88 {strides = array<i32>} : memref<32x128xf32, #tpu.memory_space<vmem>>, vector<32x128xf32>,
    return
  }
  func.func @transform_0(%arg0: i32) -> (i32, i32) {
    %c0_i32 = arith.constant 0 : i32
    %c0_i32_0 = arith.constant 0 : i32
    return %arg0, %c0_i32 : i32, i32
  }
  func.func @transform_1(%arg0: i32) -> (i32, i32, i32) {
    %c0_i32 = arith.constant 0 : i32
    %c0_i32_0 = arith.constant 0 : i32
    %c0_i32_1 = arith.constant 0 : i32
    %c0_i32_2 = arith.constant 0 : i32
    return %c0_i32, %c0_i32_0, %c0_i32_1 : i32, i32, i32
  }
  func.func @transform_2(%arg0: i32) -> (i32, i32) {
    %c0_i32 = arith.constant 0 : i32
    %c0_i32_0 = arith.constant 0 : i32
    %c0_i32_1 = arith.constant 0 : i32
    return %c0_i32, %c0_i32_0 : i32, i32
  }
  func.func @transform_3(%arg0: i32) -> (i32, i32, i32) {
    %c0_i32 = arith.constant 0 : i32
    %c0_i32_0 = arith.constant 0 : i32
    %c0_i32_1 = arith.constant 0 : i32
    %c0_i32_2 = arith.constant 0 : i32
    return %c0_i32, %c0_i32_0, %c0_i32_1 : i32, i32, i32
  }
  func.func @transform_4(%arg0: i32) -> (i32, i32) {
    %c0_i32 = arith.constant 0 : i32
    %c0_i32_0 = arith.constant 0 : i32
    %c0_i32_1 = arith.constant 0 : i32
    return %c0_i32, %c0_i32_0 : i32, i32
  }
  func.func @transform_5(%arg0: i32) -> (i32, i32) {
    %c0_i32 = arith.constant 0 : i32
    %c0_i32_0 = arith.constant 0 : i32
    return %arg0, %c0_i32 : i32, i32
  }
}

</mosaic_0001>

<bundles_post_ra>
// kernel: tpu_custom_call.1
= control target key start
LH: loop header
LB: loop body
LE: loop exit
PB: predicated region body
PF: predicated region fallthrough
CT: control target
= control target key end

     0   :  { %10 = vsyncpa [#allocation3], 0  ;;  %s1593_s0 = inlined_call_operand.hbm [shape: f32[32,128], index: 0, kind: input, shape index: {}]   ;;  %s1594_s1 = inlined_call_operand.hbm [shape: bf16[3,128,128], index: 1, kind: input, shape index: {}]   ;;  %s1595_s2 = inlined_call_operand.vmem [shape: f32[1,128], index: 2, kind: input, shape index: {}]   ;;  %s1596_s3 = inlined_call_operand.hbm [shape: bf16[3,128,128], index: 3, kind: input, shape index: {}]   ;;  %s1597_s4 = inlined_call_operand.vmem [shape: f32[1,128], index: 4, kind: input, shape index: {}]   ;;  %s1598_s5 = inlined_call_operand.hbm [shape: f32[32,128], index: 5, kind: output, shape index: {}]  }
   0x1   :  { %11 = vsyncpa [#allocation6], 0 }
   0x2   :  { %12 = vsyncpa [#allocation4], 0  ;;  %s1377_s18 = smov [#allocation5]   ;;  %s1283_s22 = scalar_lea.hbm %s1594_s1, 3072 }
   0x3   :  { %s30_s19 = sshll.u32 %s1377_s18, 4  ;;  %p1284_p0 = scmp.ne.s32.totalorder %s1594_s1, %s1283_s22  ;;  %s31_s19 = int_to_ptr.vmem [resolvable:$true] %s30_s19 }
   0x4   :  { %p1287_p1 = scmp.lt.u32.totalorder %s1283_s22, %s1594_s1 }
   0x6   :  { %p1289_p2 = pnand %p1287_p1, %p1284_p0 }
   0x8   :  { %1292 = shalt.err (!%p1289_p2)
}
   0x9   :  { %s1293_s27 = scalar_lea.vmem %s31_s19, 3072  ;;  %p1298_p4 = scmp.lt.s32.totalorder %s31_s19, %s31_s19 }
   0xa   :  { %p1294_p3 = scmp.ne.s32.totalorder %s31_s19, %s1293_s27  ;;  %p1299_p5 = scmp.lt.s32.totalorder %s1293_s27, %s1293_s27 }
   0xc   :  { %p1300_p6 = por %p1299_p5, %p1298_p4 }
   0xe   :  { %p1301_p7 = pnand %p1300_p6, %p1294_p3 }
  0x10   :  { %1304 = shalt.err (!%p1301_p7)
}
  0x11   :  { %s1378_s28 = smov 64   ;;  %s1379_s29 = smov 4  }
  0x12   :  { %36 = dma.hbm_to_vmem [thread:$0]  %s1594_s1, 3072, %s31_s19, [#allocation6], %s1378_s28, %s1378_s28, %s1379_s29  }
  0x13   :  { %s1380_s7 = smov [#allocation2]   ;;  %s1305_s11 = scalar_lea.hbm %s1593_s0, 512 }
  0x14   :  { %s18_s8 = sshll.u32 %s1380_s7, 4  ;;  %p1306_p8 = scmp.ne.s32.totalorder %s1593_s0, %s1305_s11  ;;  %s19_s8 = int_to_ptr.vmem [resolvable:$true] %s18_s8 }
  0x15   :  { %p1309_p9 = scmp.lt.u32.totalorder %s1305_s11, %s1593_s0 }
  0x17   :  { %p1311_p10 = pnand %p1309_p9, %p1306_p8 }
  0x19   :  { %1314 = shalt.err (!%p1311_p10)
}
  0x1a   :  { %s1315_s16 = scalar_lea.vmem %s19_s8, 512  ;;  %p1320_p12 = scmp.lt.s32.totalorder %s19_s8, %s19_s8 }
  0x1b   :  { %p1316_p11 = scmp.ne.s32.totalorder %s19_s8, %s1315_s16  ;;  %p1321_p13 = scmp.lt.s32.totalorder %s1315_s16, %s1315_s16 }
  0x1d   :  { %p1322_p0 = por %p1321_p13, %p1320_p12 }
  0x1f   :  { %p1323_p1 = pnand %p1322_p0, %p1316_p11 }
  0x21   :  { %1326 = shalt.err (!%p1323_p1)
}
  0x22   :  { %s1381_s1 = smov 128   ;;  %s1382_s17 = smov 8  }
  0x23   :  { %24 = dma.hbm_to_vmem [thread:$0]  %s1593_s0, 512, %s19_s8, [#allocation3], %s1381_s1, %s1381_s1, %s1382_s17  }
  0x24   :  { %s1383_s20 = smov [#allocation7]   ;;  %s1327_s24 = scalar_lea.hbm %s1596_s3, 3072 }
  0x25   :  { %s44_s21 = sshll.u32 %s1383_s20, 4  ;;  %p1328_p2 = scmp.ne.s32.totalorder %s1596_s3, %s1327_s24  ;;  %s45_s21 = int_to_ptr.vmem [resolvable:$true] %s44_s21 }
  0x26   :  { %p1331_p3 = scmp.lt.u32.totalorder %s1327_s24, %s1596_s3 }
  0x28   :  { %p1333_p4 = pnand %p1331_p3, %p1328_p2 }
  0x2a   :  { %1336 = shalt.err (!%p1333_p4)
}
  0x2b   :  { %s1337_s6 = scalar_lea.vmem %s45_s21, 3072  ;;  %p1342_p6 = scmp.lt.s32.totalorder %s45_s21, %s45_s21 }
  0x2c   :  { %p1338_p5 = scmp.ne.s32.totalorder %s45_s21, %s1337_s6  ;;  %p1343_p7 = scmp.lt.s32.totalorder %s1337_s6, %s1337_s6 }
  0x2e   :  { %p1344_p8 = por %p1343_p7, %p1342_p6 }
  0x30   :  { %p1345_p9 = pnand %p1344_p8, %p1338_p5 }
  0x32   :  { %1348 = shalt.err (!%p1345_p9)
}
  0x33   :  { %50 = dma.hbm_to_vmem [thread:$0]  %s1596_s3, 3072, %s45_s21, [#allocation6], %s1378_s28, %s1378_s28, %s1379_s29  }
  0x34   :  { %1371 = dma.done.wait [#allocation3], 512  }
  0x35   :  { %1372 = vsyncadd [#allocation3], 4294966784 }
  0x36   :  { %1373 = dma.done.wait [#allocation6], 6144  }
  0x37   :  { %1374 = vsyncadd [#allocation6], 4294961152  ;;  %v1235_v0 = vld [vmem:[#allocation5 + $0x40] sm:$0xff]   ;;  %v1236_v1 = vld [vmem:[#allocation5 + $0x48] sm:$0xff]   ;;  %v67_v7 = vlaneseq  ;;  %vm1384_vm2 = vmmov 1   ;;  %s1385_s8 = smov [#allocation8]  }
  0x38   :  { %1090 = vmatprep.subr.bf16.mxu0 %v1235_v0  ;;  %v1237_v2 = vld [vmem:[#allocation5 + $0x50] sm:$0xff]   ;;  %v1238_v3 = vld [vmem:[#allocation5 + $0x58] sm:$0xff]   ;;  %v1461_v4 = vld [vmem:[#allocation2] sm:$0xff]  ;;  %s943_s9 = sshll.u32 %s1385_s8, 4  ;;  %s944_s9 = int_to_ptr.vmem [resolvable:$true] %s943_s9 }
  0x39   :  { %1091 = vmatpush3.bf16.msra.mxu0 %v1235_v0  ;;  %v1463_v5 = vld [vmem:[#allocation2 + $0x8] sm:$0xff]  ;;  %v1239_v8 = vld [vmem:[#allocation5 + $0x60] sm:$0xff]   ;;  %v1467_v9 = vshrl.u32 %v67_v7, 7  ;;  %v1241_v12 = vld [vmem:[#allocation5 + $0x70] sm:$0xff]   ;;  %v152_v15 = vrot.slane %v1461_v4, 7  ;;  %v396_v43 = vrot.slane %v1461_v4, 1  ;;  %p1354_p11 = scmp.lt.s32.totalorder %s944_s9, %s944_s9 }
  0x3a   :  { %1092 = vmatprep.subr.bf16.mxu0 %v1236_v1  ;;  %v183_v6 = vpack.c.bf16 %v1463_v5, %v1461_v4  ;;  %v1240_v10 = vld [vmem:[#allocation5 + $0x68] sm:$0xff]   ;;  %v1242_v13 = vld [vmem:[#allocation5 + $0x78] sm:$0xff]   ;;  %v153_v17 = vrot.slane %v1463_v5, 7  ;;  %v1243_v19 = vld [vmem:[#allocation5] sm:$0xff]   ;;  %v397_v44 = vrot.slane %v1463_v5, 1 }
  0x3b   :  { %v76_v11 = vand.u32 15, %v1467_v9  ;;  %v1471_v16 = vld [vmem:[#allocation2 + $0x18] sm:$0xff]  ;;  %vm156_vm0 = vcmp.lt.s32.totalorder %v1467_v9, 1  ;;  %v1476_v20 = vld [vmem:[#allocation2 + $0x10] sm:$0xff]  ;;  %v1259_v21 = vld [vmem:[#allocation7 + $0x40] sm:$0xff]   ;;  %v70_v37 = vadd.s32 16, %v1467_v9 }
  0x3c   :  { %1106 = vmatprep.mubr.bf16.mxu0 %v183_v6  ;;  %v155_v18 = vrot.slane %v1471_v16, 7  ;;  %v159_v22 = vsel %vm156_vm0, %v152_v15, %v153_v17  ;;  %v1260_v24 = vld [vmem:[#allocation7 + $0x48] sm:$0xff]   ;;  %1150 = vmatprep.subr.bf16.mxu1 %v1259_v21  ;;  %v184_v25 = vpack.c.bf16 %v1471_v16, %v1476_v20  ;;  %v1261_v29 = vld [vmem:[#allocation7 + $0x50] sm:$0xff]   ;;  %v1262_v30 = vld [vmem:[#allocation7 + $0x58] sm:$0xff]   ;;  %v69_v38 = vadd.s32 8, %v1467_v9 }
  0x3d   :  { %1093 = vmatpush3.bf16.msra.mxu0 %v1236_v1  ;;  %v120_v14 = vadd.s32 4294967295, %v76_v11  ;;  %1151 = vmatpush3.bf16.msra.mxu1 %v1259_v21  ;;  %v1244_v27 = vld [vmem:[#allocation5 + $0x8] sm:$0xff]   ;;  %v1245_v31 = vld [vmem:[#allocation5 + $0x10] sm:$0xff]   ;;  %v1263_v32 = vld [vmem:[#allocation7 + $0x60] sm:$0xff]   ;;  %v90_v40 = vand.u32 15, %v70_v37  ;;  %v154_v42 = vrot.slane %v1476_v20, 7 }
  0x3e   :  { %1094 = vmatprep.subr.bf16.mxu0 %v1237_v2  ;;  %v160_v23 = vsel %vm156_vm0, %v155_v18, %v152_v15  ;;  %1152 = vmatprep.subr.bf16.mxu1 %v1260_v24  ;;  %v1246_v33 = vld [vmem:[#allocation5 + $0x18] sm:$0xff]   ;;  %v1264_v34 = vld [vmem:[#allocation7 + $0x68] sm:$0xff]   ;;  %v1247_v35 = vld [vmem:[#allocation5 + $0x20] sm:$0xff]   ;;  %v83_v41 = vand.u32 15, %v69_v38  ;;  %v398_v45 = vrot.slane %v1476_v20, 1  ;;  %vm400_vm4 = vcmp.lt.s32.totalorder %v1467_v9, 7 }
  0x3f   :  { %vm124_vm1 = vcmp.ge.s32.totalorder %v120_v14, 0  ;;  %v973_v28 = vpack.c.bf16 %v159_v22, %v160_v23  ;;  %v1248_v36 = vld [vmem:[#allocation5 + $0x28] sm:$0xff]   ;;  %v1249_v39 = vld [vmem:[#allocation5 + $0x30] sm:$0xff]   ;;  %v1250_v46 = vld [vmem:[#allocation5 + $0x38] sm:$0xff]   ;;  %v122_v47 = vadd.s32 4294967295, %v90_v40  ;;  %v157_v49 = vsel %vm156_vm0, %v154_v42, %v155_v18 }
  0x40   :  { %vm1489_vm3 = vmpackc.low %vm1384_vm2, %vm124_vm1  ;;  %v137_v48 = vadd.s32 1, %v83_v41  ;;  %v158_v50 = vsel %vm156_vm0, %v153_v17, %v154_v42  ;;  %v1251_v51 = vld [vmem:[#allocation5 + $0x80] sm:$0xff]   ;;  %v402_v52 = vsel %vm400_vm4, %v397_v44, %v398_v45  ;;  %v403_v53 = vsel %vm400_vm4, %v396_v43, %v397_v44  ;;  %v1252_v57 = vld [vmem:[#allocation5 + $0x88] sm:$0xff]  }
  0x41   :  { %1095 = vmatpush3.bf16.msra.mxu0 %v1237_v2  ;;  %1153 = vmatpush3.bf16.msra.mxu1 %v1260_v24  ;;  %vm126_vm5 = vcmp.ge.s32.totalorder %v122_v47, 0  ;;  %v976_v54 = vpack.c.bf16 %v157_v49, %v158_v50  ;;  %v987_v56 = vpack.c.bf16 %v402_v52, %v403_v53  ;;  %v1253_v59 = vld [vmem:[#allocation5 + $0x90] sm:$0xff]   ;;  %v1254_v60 = vld [vmem:[#allocation5 + $0x98] sm:$0xff]   ;;  %v1255_v61 = vld [vmem:[#allocation5 + $0xa0] sm:$0xff]   ;;  %v71_v63 = vadd.s32 24, %v1467_v9 }
  0x42   :  { %1096 = vmatprep.subr.bf16.mxu0 %v1238_v3  ;;  %1154 = vmatprep.subr.bf16.mxu1 %v1261_v29  ;;  %vm145_vm6 = vcmp.lt.s32.totalorder %v137_v48, 16  ;;  %vm1515_vm7 = vmpackc.low %vm1384_vm2, %vm126_vm5  ;;  %v1256_v62 = vld [vmem:[#allocation5 + $0xa8] sm:$0xff]   ;;  %v1257_v0 = vld [vmem:[#allocation5 + $0xb0] sm:$0xff]   ;;  %v399_v2 = vrot.slane %v1471_v16, 1 }
  0x43   :  { %vm1520_vm8 = vmpackc.low %vm145_vm6, %vm1384_vm2  ;;  %v97_v1 = vand.u32 15, %v71_v63  ;;  %v1267_v14 = vld [vmem:[#allocation7] sm:$0xff]   ;;  %v1273_v9 = vld [vmem:[#allocation7 + $0x30] sm:$0xff]  }
  0x44   :  { %v401_v7 = vsel %vm400_vm4, %v398_v45, %v399_v2  ;;  %v992_v15 = vld [vmem:[%s1595_s2] ss:$0 sm:$0xff]  ;;  %v1268_v45 = vld [vmem:[#allocation7 + $0x8] sm:$0xff]   ;;  %v1278_v63 = vld [vmem:[#allocation7 + $0x98] sm:$0xff]  }
  0x45   :  { %1097 = vmatpush3.bf16.msra.mxu0 %v1238_v3  ;;  %1155 = vmatpush3.bf16.msra.mxu1 %v1261_v29  ;;  %v1258_v3 = vld [vmem:[#allocation5 + $0xb8] sm:$0xff]   ;;  %v139_v6 = vadd.s32 1, %v97_v1  ;;  %v1275_v26 = vld [vmem:[#allocation7 + $0x80] sm:$0xff]   ;;  %v1280_v1 = vld [vmem:[#allocation7 + $0xa8] sm:$0xff]  }
  0x46   :  { %1098 = vmatprep.subr.bf16.mxu0 %v1239_v8  ;;  %1156 = vmatprep.subr.bf16.mxu1 %v1262_v30  ;;  %v1282_v55 = vld [vmem:[#allocation7 + $0xb8] sm:$0xff]   ;;  %v1029_v58 = vld [vmem:[%s1597_s4] ss:$0 sm:$0xff]  ;;  %s1349_s4 = scalar_lea.vmem %s944_s9, 512 }
  0x47   :  { %vm147_vm9 = vcmp.lt.s32.totalorder %v139_v6, 16  ;;  %p1350_p10 = scmp.ne.s32.totalorder %s944_s9, %s1349_s4  ;;  %p1355_p12 = scmp.lt.s32.totalorder %s1349_s4, %s1349_s4 }
  0x48   :  { %vm1535_vm10 = vmpackc.low %vm147_vm9, %vm1384_vm2 }
  0x49   :  { %1099 = vmatpush3.bf16.msra.mxu0 %v1239_v8  ;;  %1157 = vmatpush3.bf16.msra.mxu1 %v1262_v30  ;;  %v404_v8 = vsel %vm400_vm4, %v399_v2, %v396_v43  ;;  %v1281_v2 = vld [vmem:[#allocation7 + $0xb0] sm:$0xff]   ;;  %p1356_p13 = por %p1355_p12, %p1354_p11 }
  0x4a   :  { %1100 = vmatprep.subr.bf16.mxu0 %v1240_v10  ;;  %1158 = vmatprep.subr.bf16.mxu1 %v1263_v32 }
  0x4b   :  { %p1357_p0 = pnand %p1356_p13, %p1350_p10 }
  0x4d   :  { %1101 = vmatpush3.bf16.msra.mxu0 %v1240_v10  ;;  %1159 = vmatpush3.bf16.msra.mxu1 %v1263_v32  ;;  %v990_v10 = vpack.c.bf16 %v404_v8, %v401_v7 }
  0x4e   :  { %1102 = vmatprep.subr.bf16.mxu0 %v1241_v12  ;;  %1160 = vmatprep.subr.bf16.mxu1 %v1264_v34 }
  0x51   :  { %1103 = vmatpush3.bf16.msra.mxu0 %v1241_v12  ;;  %1161 = vmatpush3.bf16.msra.mxu1 %v1264_v34  ;;  %v1265_v12 = vld [vmem:[#allocation7 + $0x70] sm:$0xff]  }
  0x52   :  { %1104 = vmatprep.subr.bf16.mxu0 %v1242_v13  ;;  %1162 = vmatprep.subr.bf16.mxu1 %v1265_v12 }
  0x55   :  { %1105 = vmatpush3.bf16.msra.mxu0 %v1242_v13  ;;  %1163 = vmatpush3.bf16.msra.mxu1 %v1265_v12  ;;  %v1266_v13 = vld [vmem:[#allocation7 + $0x78] sm:$0xff]  }
  0x56   :  { %1110 = vmatprep.subr.bf16.mxu0 %v1243_v19  ;;  %1164 = vmatprep.subr.bf16.mxu1 %v1266_v13 }
  0x58   :  { %1107 = vmatmul.mubr.bf16.vlgmr.msra.gmra.mrb[0].mxu0 %v184_v25 }
  0x59   :  { %1111 = vmatpush3.bf16.msra.mxu0 %v1243_v19  ;;  %1126 = vmatprep.mubr.msk.bf16.mxu0 %vm1489_vm3, %v973_v28 }
  0x5a   :  { %1112 = vmatprep.subr.bf16.mxu0 %v1244_v27  ;;  %1165 = vmatpush3.bf16.msra.mxu1 %v1266_v13 }
  0x5b   :  { %1170 = vmatprep.subr.bf16.mxu1 %v1267_v14 }
  0x5d   :  { %1113 = vmatpush3.bf16.msra.mxu0 %v1244_v27 }
  0x5e   :  { %1114 = vmatprep.subr.bf16.mxu0 %v1245_v31 }
  0x61   :  { %1115 = vmatpush3.bf16.msra.mxu0 %v1245_v31 }
  0x62   :  { %1116 = vmatprep.subr.bf16.mxu0 %v1246_v33 }
  0x65   :  { %1117 = vmatpush3.bf16.msra.mxu0 %v1246_v33 }
  0x66   :  { %1118 = vmatprep.subr.bf16.mxu0 %v1247_v35 }
  0x69   :  { %1119 = vmatpush3.bf16.msra.mxu0 %v1247_v35 }
  0x6a   :  { %1120 = vmatprep.subr.bf16.mxu0 %v1248_v36 }
  0x6d   :  { %1121 = vmatpush3.bf16.msra.mxu0 %v1248_v36 }
  0x6e   :  { %1122 = vmatprep.subr.bf16.mxu0 %v1249_v39 }
  0x71   :  { %1123 = vmatpush3.bf16.msra.mxu0 %v1249_v39 }
  0x72   :  { %1124 = vmatprep.subr.bf16.mxu0 %v1250_v46 }
  0x75   :  { %1125 = vmatpush3.bf16.msra.mxu0 %v1250_v46 }
  0x76   :  { %1130 = vmatprep.subr.bf16.mxu0 %v1251_v51 }
  0x78   :  { %1127 = vmatmul.mubr.msk.bf16.vlgmr.msra.gmra.mrb[0].mxu0 %vm1515_vm7, %v976_v54  ;;  %v1269_v54 = vld [vmem:[#allocation7 + $0x10] sm:$0xff]  }
  0x79   :  { %1131 = vmatpush3.bf16.msra.mxu0 %v1251_v51  ;;  %1146 = vmatprep.mubr.msk.bf16.mxu0 %vm1520_vm8, %v987_v56  ;;  %v1270_v56 = vld [vmem:[#allocation7 + $0x18] sm:$0xff]  }
  0x7a   :  { %1132 = vmatprep.subr.bf16.mxu0 %v1252_v57 }
  0x7d   :  { %1133 = vmatpush3.bf16.msra.mxu0 %v1252_v57  ;;  %v1271_v57 = vld [vmem:[#allocation7 + $0x20] sm:$0xff]  }
  0x7e   :  { %1134 = vmatprep.subr.bf16.mxu0 %v1253_v59 }
  0x81   :  { %1135 = vmatpush3.bf16.msra.mxu0 %v1253_v59  ;;  %v1272_v59 = vld [vmem:[#allocation7 + $0x28] sm:$0xff]  }
  0x82   :  { %1136 = vmatprep.subr.bf16.mxu0 %v1254_v60 }
  0x85   :  { %1137 = vmatpush3.bf16.msra.mxu0 %v1254_v60  ;;  %v1274_v60 = vld [vmem:[#allocation7 + $0x38] sm:$0xff]  }
  0x86   :  { %1138 = vmatprep.subr.bf16.mxu0 %v1255_v61 }
  0x89   :  { %1139 = vmatpush3.bf16.msra.mxu0 %v1255_v61  ;;  %v1276_v61 = vld [vmem:[#allocation7 + $0x88] sm:$0xff]  }
  0x8a   :  { %1140 = vmatprep.subr.bf16.mxu0 %v1256_v62 }
  0x8d   :  { %1141 = vmatpush3.bf16.msra.mxu0 %v1256_v62  ;;  %v1277_v62 = vld [vmem:[#allocation7 + $0x90] sm:$0xff]  }
  0x8e   :  { %1142 = vmatprep.subr.bf16.mxu0 %v1257_v0 }
  0x91   :  { %1143 = vmatpush3.bf16.msra.mxu0 %v1257_v0  ;;  %v1279_v0 = vld [vmem:[#allocation7 + $0xa0] sm:$0xff]  }
  0x92   :  { %1144 = vmatprep.subr.bf16.mxu0 %v1258_v3 }
  0x95   :  { %1145 = vmatpush3.bf16.msra.mxu0 %v1258_v3 }
  0x98   :  { %1147 = vmatmul.mubr.msk.bf16.vlgmr.msra.gmra.mrb[0].mxu0 %vm1535_vm10, %v990_v10 }
 0x16b   :  { %v1148_v17 = vpop.f32.mrb[0].mxu0 }
 0x16c   :  { %v538_v18 = vadd.f32 %v1148_v17, %v992_v15  ;;  %v510_v19 = vpop.f32.mrb[1].mxu0 }
 0x16d   :  { %v536_v21 = vadd.f32 %v992_v15, %v510_v19  ;;  %v1149_v22 = vpop.f32.mrb[2].mxu0 }
 0x16e   :  { %v542_v23 = vmax.f32 %v538_v18, 0.0  ;;  %v539_v24 = vadd.f32 %v1149_v22, %v992_v15  ;;  %v513_v25 = vpop.f32.mrb[3].mxu0 }
 0x16f   :  { %v540_v27 = vmax.f32 %v536_v21, 0.0  ;;  %v537_v28 = vadd.f32 %v992_v15, %v513_v25 }
 0x170   :  { %v543_v29 = vmax.f32 %v539_v24, 0.0  ;;  %v546_v30 = vrot.slane %v542_v23, 7  ;;  %v789_v34 = vrot.slane %v542_v23, 1 }
 0x171   :  { %v544_v31 = vrot.slane %v540_v27, 7  ;;  %v787_v32 = vrot.slane %v540_v27, 1  ;;  %v541_v33 = vmax.f32 %v537_v28, 0.0 }
 0x172   :  { %v547_v35 = vrot.slane %v543_v29, 7  ;;  %v790_v36 = vrot.slane %v543_v29, 1  ;;  %v575_v37 = vpack.c.bf16 %v543_v29, %v542_v23 }
 0x173   :  { %v545_v38 = vrot.slane %v541_v33, 7  ;;  %v788_v39 = vrot.slane %v541_v33, 1  ;;  %v574_v40 = vpack.c.bf16 %v541_v33, %v540_v27 }
 0x174   :  { %v548_v41 = vsel %vm156_vm0, %v546_v30, %v547_v35  ;;  %v1548_v42 = vsel %vm400_vm4, %v789_v34, %v790_v36  ;;  %v794_v43 = vsel %vm400_vm4, %v790_v36, %v787_v32  ;;  %v551_v44 = vsel %vm156_vm0, %v547_v35, %v544_v31 }
 0x175   :  { %v1027_v46 = vpack.c.bf16 %v794_v43, %v1548_v42  ;;  %v549_v47 = vsel %vm156_vm0, %v545_v38, %v546_v30  ;;  %1166 = vmatprep.mubr.bf16.mxu1 %v574_v40  ;;  %v550_v48 = vsel %vm156_vm0, %v544_v31, %v545_v38  ;;  %v792_v49 = vsel %vm400_vm4, %v788_v39, %v789_v34 }
 0x176   :  { %v1013_v50 = vpack.c.bf16 %v548_v41, %v549_v47  ;;  %1167 = vmatmul.mubr.bf16.vlgmr.msra.gmra.mrb[0].mxu1 %v575_v37  ;;  %v1010_v51 = vpack.c.bf16 %v550_v48, %v551_v44  ;;  %v793_v52 = vsel %vm400_vm4, %v787_v32, %v788_v39 }
 0x177   :  { %1171 = vmatpush3.bf16.msra.mxu1 %v1267_v14  ;;  %v1024_v53 = vpack.c.bf16 %v792_v49, %v793_v52 }
 0x178   :  { %1186 = vmatprep.mubr.msk.bf16.mxu1 %vm1489_vm3, %v1010_v51  ;;  %1172 = vmatprep.subr.bf16.mxu1 %v1268_v45 }
 0x17b   :  { %1173 = vmatpush3.bf16.msra.mxu1 %v1268_v45 }
 0x17c   :  { %1174 = vmatprep.subr.bf16.mxu1 %v1269_v54 }
 0x17f   :  { %1175 = vmatpush3.bf16.msra.mxu1 %v1269_v54 }
 0x180   :  { %1176 = vmatprep.subr.bf16.mxu1 %v1270_v56 }
 0x183   :  { %1177 = vmatpush3.bf16.msra.mxu1 %v1270_v56 }
 0x184   :  { %1178 = vmatprep.subr.bf16.mxu1 %v1271_v57 }
 0x187   :  { %1179 = vmatpush3.bf16.msra.mxu1 %v1271_v57 }
 0x188   :  { %1180 = vmatprep.subr.bf16.mxu1 %v1272_v59 }
 0x18b   :  { %1181 = vmatpush3.bf16.msra.mxu1 %v1272_v59 }
 0x18c   :  { %1182 = vmatprep.subr.bf16.mxu1 %v1273_v9 }
 0x18f   :  { %1183 = vmatpush3.bf16.msra.mxu1 %v1273_v9 }
 0x190   :  { %1184 = vmatprep.subr.bf16.mxu1 %v1274_v60 }
 0x193   :  { %1185 = vmatpush3.bf16.msra.mxu1 %v1274_v60 }
 0x194   :  { %1190 = vmatprep.subr.bf16.mxu1 %v1275_v26 }
 0x196   :  { %1187 = vmatmul.mubr.msk.bf16.vlgmr.msra.gmra.mrb[0].mxu1 %vm1515_vm7, %v1013_v50 }
 0x197   :  { %1191 = vmatpush3.bf16.msra.mxu1 %v1275_v26  ;;  %1206 = vmatprep.mubr.msk.bf16.mxu1 %vm1520_vm8, %v1024_v53 }
 0x198   :  { %1192 = vmatprep.subr.bf16.mxu1 %v1276_v61 }
 0x19b   :  { %1193 = vmatpush3.bf16.msra.mxu1 %v1276_v61 }
 0x19c   :  { %1194 = vmatprep.subr.bf16.mxu1 %v1277_v62 }
 0x19f   :  { %1195 = vmatpush3.bf16.msra.mxu1 %v1277_v62 }
 0x1a0   :  { %1196 = vmatprep.subr.bf16.mxu1 %v1278_v63 }
 0x1a3   :  { %1197 = vmatpush3.bf16.msra.mxu1 %v1278_v63 }
 0x1a4   :  { %1198 = vmatprep.subr.bf16.mxu1 %v1279_v0 }
 0x1a7   :  { %1199 = vmatpush3.bf16.msra.mxu1 %v1279_v0 }
 0x1a8   :  { %1200 = vmatprep.subr.bf16.mxu1 %v1280_v1 }
 0x1ab   :  { %1201 = vmatpush3.bf16.msra.mxu1 %v1280_v1 }
 0x1ac   :  { %1202 = vmatprep.subr.bf16.mxu1 %v1281_v2 }
 0x1af   :  { %1203 = vmatpush3.bf16.msra.mxu1 %v1281_v2 }
 0x1b0   :  { %1204 = vmatprep.subr.bf16.mxu1 %v1282_v55 }
 0x1b3   :  { %1205 = vmatpush3.bf16.msra.mxu1 %v1282_v55 }
 0x1b6   :  { %1207 = vmatmul.mubr.msk.bf16.vlgmr.msra.gmra.mrb[0].mxu1 %vm1535_vm10, %v1027_v46 }
 0x289   :  { %v1208_v3 = vpop.f32.mrb[0].mxu1 }
 0x28a   :  { %v928_v6 = vadd.f32 %v1208_v3, %v1029_v58  ;;  %v900_v7 = vpop.f32.mrb[1].mxu1 }
 0x28b   :  { %v926_v8 = vadd.f32 %v1029_v58, %v900_v7  ;;  %v1209_v10 = vpop.f32.mrb[2].mxu1 }
 0x28c   :  { %v932_v12 = vadd.f32 %v928_v6, %v1476_v20  ;;  %v929_v13 = vadd.f32 %v1209_v10, %v1029_v58  ;;  %v903_v14 = vpop.f32.mrb[3].mxu1 }
 0x28d   :  { %v930_v15 = vadd.f32 %v926_v8, %v1461_v4  ;;  %v927_v17 = vadd.f32 %v1029_v58, %v903_v14 }
 0x28e   :  { %936 = vst [vmem:[#allocation8 + $0x10] sm:$0xff] %v932_v12  ;;  %v933_v11 = vadd.f32 %v929_v13, %v1471_v16 }
 0x28f   :  { %934 = vst [vmem:[#allocation8] sm:$0xff] %v930_v15  ;;  %v931_v18 = vadd.f32 %v927_v17, %v1463_v5 }
 0x290   :  { %937 = vst [vmem:[#allocation8 + $0x18] sm:$0xff] %v933_v11 }
 0x291   :  { %935 = vst [vmem:[#allocation8 + $0x8] sm:$0xff] %v931_v18 }
 0x292   :  { %1360 = shalt.err (!%p1357_p0)
}
 0x293   :  { %s1361_s12 = scalar_lea.hbm %s1598_s5, 512 }
 0x294   :  { %p1362_p1 = scmp.ne.s32.totalorder %s1598_s5, %s1361_s12  ;;  %p1365_p2 = scmp.lt.u32.totalorder %s1361_s12, %s1598_s5 }
 0x296   :  { %p1367_p3 = pnand %p1365_p2, %p1362_p1 }
 0x298   :  { %1370 = shalt.err (!%p1367_p3)
}
 0x299   :  { %949 = dma.vmem_to_hbm [thread:$0]  %s944_s9, 512, %s1598_s5, [#allocation4], %s1381_s1, %s1381_s1, %s1382_s17  }
 0x29a   :  { %1375 = dma.done.wait [#allocation4], 512  }
 0x29b   :  { %1376 = vsyncadd [#allocation4], 4294966784 }
 0x29c   :  { %953 = vsyncpa [#allocation3], 1 }
 0x29d   :  { %954 = vsyncpa [#allocation6], 1 }
 0x29e   :  { %955 = vsyncpa [#allocation4], 1 }

</bundles_post_ra>
